<compile_context>
chip_gen: v7x
topology: tpu7x:2x2x1
jax: 0.10.0
libtpu: 0.0.40
codegen_flags: <defaults>
</compile_context>

<pallas_src>
import jax
import jax.numpy as jnp
from jax import lax
from jax.experimental import pallas as pl
from jax.experimental.pallas import tpu as pltpu


_UNROLL_T_MAX = 16  # statically unroll the time recurrence up to this trip count


def nts_rnn_kernel(x_ref,                       # (T, TB)   batch on lanes
                   wih1_ref, whh1_ref, b1_ref,  # (H0, 1), (H0, H0), (H0, 1)
                   wih2_ref, b2_ref,            # (H1, H0), (H1, 1)
                   wih3_ref, b3_ref,            # (H2, H1), (H2, 1)
                   wlin_ref, blin_ref,          # (1, H2), (1, 1)
                   out_ref):                    # (1, TB)   batch on lanes
    T, TB = x_ref.shape
    H0 = whh1_ref.shape[0]

    # ---- hoisted loads (outside the recurrent loop) ----
    wih1 = wih1_ref[...]                                   # (H0, 1)
    whh1 = whh1_ref[...]                                   # (H0, H0)
    b1 = b1_ref[...]                                       # (H0, 1)

    # Two independent batch sub-chains when each half is still lane-dense.
    n_chains = 2 if (TB >= 256 and TB % 256 == 0) else 1
    TBH = TB // n_chains

    b1b = jnp.broadcast_to(b1, (H0, TBH))                  # hoisted, once

    def step_chain(x_chunk, h):
        # x_chunk: (1, TBH), h: (H0, TBH)
        pre = wih1 * x_chunk + b1b                         # VPU, off the chain
        return jnp.tanh(pre + jnp.dot(whh1, h,
                                      preferred_element_type=jnp.float32))

    hs = [jnp.zeros((H0, TBH), jnp.float32) for _ in range(n_chains)]

    if T <= _UNROLL_T_MAX:
        # Short sequences: static unroll (keeps LLO scheduler visibility,
        # small enough not to blow the 64-vreg file).
        for t in range(T):
            x_row = x_ref[t:t + 1, :]                      # (1, TB) sublane slice
            hs = [step_chain(x_row[:, c * TBH:(c + 1) * TBH], hs[c])
                  for c in range(n_chains)]
    else:
        # Long sequences: fori_loop bounds live ranges; unroll=8 keeps the
        # per-iteration schedule visible to the LLO scheduler.
        def body(t, carry):
            x_row = x_ref[pl.ds(t, 1), :]                  # (1, TB) sublane slice
            return tuple(step_chain(x_row[:, c * TBH:(c + 1) * TBH], carry[c])
                         for c in range(n_chains))
        hs = list(lax.fori_loop(0, T, body, tuple(hs), unroll=8))

    # ---- rnn_2 / rnn_3 (length-1 sequence, zero initial hidden) + linear ----
    # Computed per sub-chain in the same (H, TB) orientation; output written
    # as disjoint lane-dense slices of the (1, TB) row (no concat needed).
    wih2 = wih2_ref[...]                                   # (H1, H0)
    b2 = b2_ref[...]                                       # (H1, 1)
    wih3 = wih3_ref[...]                                   # (H2, H1)
    b3 = b3_ref[...]                                       # (H2, 1)
    wlin = wlin_ref[...]                                   # (1, H2)
    blin = blin_ref[...]                                   # (1, 1)

    for c in range(n_chains):
        h2 = jnp.tanh(jnp.dot(wih2, hs[c],
                              preferred_element_type=jnp.float32) + b2)
        h3 = jnp.tanh(jnp.dot(wih3, h2,
                              preferred_element_type=jnp.float32) + b3)
        out_ref[:, c * TBH:(c + 1) * TBH] = (
            jnp.dot(wlin, h3, preferred_element_type=jnp.float32) + blin)


def _round_up_128(n):
    return ((n + 127) // 128) * 128


def _pick_batch_tile(B, T):
    """Batch tile (lane dimension of the x block).

    * B < 256: single block with full batch (block dims == array dims, valid).
    * B >= 256: at least 2 grid steps (so v7x's two TensorCores both get
      work); TB rounded up to a 128 multiple, capped by a VMEM budget for the
      double-buffered (T, TB) x block and by 2048.
    """
    if B < 256:
        return B
    tb = _round_up_128(-(-B // 2))                 # round_up_128(cdiv(B, 2))
    budget = 16 * 1024 * 1024                      # bytes for 2x (T, TB) fp32
    tb_max = max(128, (budget // (2 * 4 * max(T, 1))) // 128 * 128)
    return int(min(tb, tb_max, 2048))


def nts_rnn_forward(x, params):
    """x: (B, T, 1) float32  ->  (B,) float32"""
    B, T, _ = x.shape
    # Batch-on-lanes layout: (T, B).
    x2 = jnp.transpose(x[..., 0]).astype(jnp.float32)          # (T, B)

    wih1 = params["W_ih1"].astype(jnp.float32)                 # (H0, 1)
    whh1 = params["W_hh1"].astype(jnp.float32)                 # (H0, H0)
    b1 = (params["b_ih1"] + params["b_hh1"])[:, None].astype(jnp.float32)  # (H0,1)
    wih2 = params["W_ih2"].astype(jnp.float32)                 # (H1, H0)
    b2 = (params["b_ih2"] + params["b_hh2"])[:, None].astype(jnp.float32)  # (H1,1)
    wih3 = params["W_ih3"].astype(jnp.float32)                 # (H2, H1)
    b3 = (params["b_ih3"] + params["b_hh3"])[:, None].astype(jnp.float32)  # (H2,1)
    wlin = params["W_lin"].astype(jnp.float32)                 # (1, H2)
    blin = params["b_lin"][None, :].astype(jnp.float32)        # (1, 1)

    H0, H1, H2 = wih1.shape[0], wih2.shape[0], wih3.shape[0]

    TB = _pick_batch_tile(B, T)
    nb = pl.cdiv(B, TB)

    def full_spec(shape):
        nd = len(shape)
        return pl.BlockSpec(shape, lambda i, _nd=nd: (0,) * _nd)

    out = pl.pallas_call(
        nts_rnn_kernel,
        out_shape=jax.ShapeDtypeStruct((1, B), jnp.float32),
        grid=(nb,),
        in_specs=[
            pl.BlockSpec((T, TB), lambda i: (0, i)),   # x, tiled over batch lanes
            full_spec((H0, 1)),                        # W_ih1
            full_spec((H0, H0)),                       # W_hh1
            full_spec((H0, 1)),                        # b1
            full_spec((H1, H0)),                       # W_ih2
            full_spec((H1, 1)),                        # b2
            full_spec((H2, H1)),                       # W_ih3
            full_spec((H2, 1)),                        # b3
            full_spec((1, H2)),                        # W_lin
            full_spec((1, 1)),                         # b_lin
        ],
        out_specs=pl.BlockSpec((1, TB), lambda i: (0, i)),     # lane-dense row
        compiler_params=pltpu.CompilerParams(
            dimension_semantics=("parallel",),
            vmem_limit_bytes=32 * 1024 * 1024),
    )(x2, wih1, whh1, b1, wih2, b2, wih3, b3, wlin, blin)
    return out[0]                                              # (B,)


def init_params(key, hidden_size):
    """Deterministic init mimicking PyTorch's U(-1/sqrt(H), 1/sqrt(H))."""
    H0, H1, H2 = hidden_size
    keys = jax.random.split(key, 16)
    u = lambda k, shape, fan: jax.random.uniform(
        k, shape, jnp.float32, -1.0 / jnp.sqrt(fan), 1.0 / jnp.sqrt(fan))
    p = {}
    # rnn_1 (input_size = 1)
    p["W_ih1"] = u(keys[0], (H0, 1), H0)
    p["W_hh1"] = u(keys[1], (H0, H0), H0)
    p["b_ih1"] = u(keys[2], (H0,), H0)
    p["b_hh1"] = u(keys[3], (H0,), H0)
    # rnn_2 (its W_hh multiplies a zero hidden -> unused)
    p["W_ih2"] = u(keys[4], (H1, H0), H1)
    p["b_ih2"] = u(keys[5], (H1,), H1)
    p["b_hh2"] = u(keys[6], (H1,), H1)
    # rnn_3
    p["W_ih3"] = u(keys[7], (H2, H1), H2)
    p["b_ih3"] = u(keys[8], (H2,), H2)
    p["b_hh3"] = u(keys[9], (H2,), H2)
    # linear
    p["W_lin"] = u(keys[10], (1, H2), H2)
    p["b_lin"] = u(keys[11], (1,), H2)
    return p


def nts_rnn_reference(x, params):
    """Plain-JAX reference of the same forward pass."""
    B, T, _ = x.shape
    h = jnp.zeros((B, params["W_ih1"].shape[0]), jnp.float32)
    for t in range(T):
        h = jnp.tanh(x[:, t, :] @ params["W_ih1"].T + params["b_ih1"]
                     + h @ params["W_hh1"].T + params["b_hh1"])
    h2 = jnp.tanh(h @ params["W_ih2"].T + params["b_ih2"] + params["b_hh2"])
    h3 = jnp.tanh(h2 @ params["W_ih3"].T + params["b_ih3"] + params["b_hh3"])
    return (h3 @ params["W_lin"].T + params["b_lin"]).reshape(-1)


def _check(x, params, atol=1e-4, rtol=1e-4):
    out = jax.block_until_ready(nts_rnn_forward(x, params))
    ref = nts_rnn_reference(x, params)
    assert out.shape == ref.shape == (x.shape[0],)
    assert jnp.allclose(out, ref, atol=atol, rtol=rtol), (out, ref)
    return out


if __name__ == "__main__":
    hidden_size = (32, 32, 32)
    key = jax.random.PRNGKey(0)
    k_p, k1, k2, k3, k4 = jax.random.split(key, 5)
    params = init_params(k_p, hidden_size)

    # 1) Small primary test: B=2, T=8 (single tile, unrolled path).
    _check(jax.random.normal(k1, (2, 8, 1), jnp.float32), params)

    # 2) Batch grid: B=1024 -> two 512-wide tiles, two interleaved sub-chains.
    _check(jax.random.normal(k2, (1024, 8, 1), jnp.float32), params)

    # 3) B not divisible by TB (900 -> tiles of 512, last block masked).
    _check(jax.random.normal(k3, (900, 8, 1), jnp.float32), params)

    # 4) Long sequence: T=40 exercises the fori_loop(unroll=8) path.
    _check(jax.random.normal(k4, (512, 40, 1), jnp.float32), params)

    print("KERNEL_OK")
</pallas_src>

<mosaic_0001>
module attributes {stable_mosaic.version = 11 : i64} {
  func.func @nts_rnn_kernel(%arg0: i32, %arg1: memref<8x2xf32, #tpu.memory_space<vmem>>, %arg2: memref<32x1xf32, #tpu.memory_space<vmem>>, %arg3: memref<32x32xf32, #tpu.memory_space<vmem>>, %arg4: memref<32x1xf32, #tpu.memory_space<vmem>>, %arg5: memref<32x32xf32, #tpu.memory_space<vmem>>, %arg6: memref<32x1xf32, #tpu.memory_space<vmem>>, %arg7: memref<32x32xf32, #tpu.memory_space<vmem>>, %arg8: memref<32x1xf32, #tpu.memory_space<vmem>>, %arg9: memref<1x32xf32, #tpu.memory_space<vmem>>, %arg10: memref<1x1xf32, #tpu.memory_space<vmem>>, %arg11: memref<1x2xf32, #tpu.memory_space<vmem>>) attributes {dimension_semantics = [#tpu.dimension_semantics<parallel>], iteration_bounds = array<i64: 1>, scalar_prefetch = 0 : i64, scratch_operands = 0 : i64, tpu.core_type = #tpu.core_type<tc>, window_params = [{transform_indices = @transform_0, window_bounds = array<i64: 8, 2>}, {pipeline_mode = #tpu.pipeline_mode<synchronous>, transform_indices = @transform_1, window_bounds = array<i64: 32, 1>}, {pipeline_mode = #tpu.pipeline_mode<synchronous>, transform_indices = @transform_2, window_bounds = array<i64: 32, 32>}, {pipeline_mode = #tpu.pipeline_mode<synchronous>, transform_indices = @transform_3, window_bounds = array<i64: 32, 1>}, {pipeline_mode = #tpu.pipeline_mode<synchronous>, transform_indices = @transform_4, window_bounds = array<i64: 32, 32>}, {pipeline_mode = #tpu.pipeline_mode<synchronous>, transform_indices = @transform_5, window_bounds = array<i64: 32, 1>}, {pipeline_mode = #tpu.pipeline_mode<synchronous>, transform_indices = @transform_6, window_bounds = array<i64: 32, 32>}, {pipeline_mode = #tpu.pipeline_mode<synchronous>, transform_indices = @transform_7, window_bounds = array<i64: 32, 1>}, {pipeline_mode = #tpu.pipeline_mode<synchronous>, transform_indices = @transform_8, window_bounds = array<i64: 1, 32>}, {pipeline_mode = #tpu.pipeline_mode<synchronous>, transform_indices = @transform_9, window_bounds = array<i64: 1, 1>}, {transform_indices = @transform_10, window_bounds = array<i64: 1, 2>}]} {
    %c0 = arith.constant 0 : index
    %c0_0 = arith.constant 0 : index
    %0 = vector.load %arg2[%c0, %c0_0] : memref<32x1xf32, #tpu.memory_space<vmem>>, vector<32x1xf32>
    %c0_1 = arith.constant 0 : index
    %c0_2 = arith.constant 0 : index
    %1 = vector.load %arg3[%c0_1, %c0_2] : memref<32x32xf32, #tpu.memory_space<vmem>>, vector<32x32xf32>
    %c0_3 = arith.constant 0 : index
    %c0_4 = arith.constant 0 : index
    %2 = vector.load %arg4[%c0_3, %c0_4] : memref<32x1xf32, #tpu.memory_space<vmem>>, vector<32x1xf32>
    %3 = vector.shape_cast %2 : vector<32x1xf32> to vector<32x1xf32>
    %4 = vector.broadcast %3 : vector<32x1xf32> to vector<32x2xf32>
    %cst = arith.constant 0.000000e+00 : f32
    %5 = vector.broadcast %cst : f32 to vector<32x2xf32>
    %c0_5 = arith.constant 0 : index
    %c0_6 = arith.constant 0 : index
    %6 = vector.load %arg1[%c0_5, %c0_6] : memref<8x2xf32, #tpu.memory_space<vmem>>, vector<1x2xf32>
    %7 = vector.broadcast %0 : vector<32x1xf32> to vector<32x2xf32>
    %8 = vector.broadcast %6 : vector<1x2xf32> to vector<32x2xf32>
    %9 = arith.mulf %7, %8 : vector<32x2xf32>
    %10 = arith.addf %9, %4 : vector<32x2xf32>
    %cst_7 = arith.constant dense<0.000000e+00> : vector<32x2xf32>
    %11 = tpu.matmul %1, %5, %cst_7 {dimension_numbers = #tpu.dot_dimension_numbers<[1], [0], [0], [1], [0, 0, 1, 1], [], []>} : vector<32x32xf32>, vector<32x2xf32>, vector<32x2xf32> -> vector<32x2xf32>
    %12 = arith.addf %10, %11 : vector<32x2xf32>
    %13 = math.tanh %12 : vector<32x2xf32>
    %c1 = arith.constant 1 : index
    %c0_8 = arith.constant 0 : index
    %14 = vector.load %arg1[%c1, %c0_8] : memref<8x2xf32, #tpu.memory_space<vmem>>, vector<1x2xf32>
    %15 = vector.broadcast %0 : vector<32x1xf32> to vector<32x2xf32>
    %16 = vector.broadcast %14 : vector<1x2xf32> to vector<32x2xf32>
    %17 = arith.mulf %15, %16 : vector<32x2xf32>
    %18 = arith.addf %17, %4 : vector<32x2xf32>
    %cst_9 = arith.constant dense<0.000000e+00> : vector<32x2xf32>
    %19 = tpu.matmul %1, %13, %cst_9 {dimension_numbers = #tpu.dot_dimension_numbers<[1], [0], [0], [1], [0, 0, 1, 1], [], []>} : vector<32x32xf32>, vector<32x2xf32>, vector<32x2xf32> -> vector<32x2xf32>
    %20 = arith.addf %18, %19 : vector<32x2xf32>
    %21 = math.tanh %20 : vector<32x2xf32>
    %c2 = arith.constant 2 : index
    %c0_10 = arith.constant 0 : index
    %22 = vector.load %arg1[%c2, %c0_10] : memref<8x2xf32, #tpu.memory_space<vmem>>, vector<1x2xf32>
    %23 = vector.broadcast %0 : vector<32x1xf32> to vector<32x2xf32>
    %24 = vector.broadcast %22 : vector<1x2xf32> to vector<32x2xf32>
    %25 = arith.mulf %23, %24 : vector<32x2xf32>
    %26 = arith.addf %25, %4 : vector<32x2xf32>
    %cst_11 = arith.constant dense<0.000000e+00> : vector<32x2xf32>
    %27 = tpu.matmul %1, %21, %cst_11 {dimension_numbers = #tpu.dot_dimension_numbers<[1], [0], [0], [1], [0, 0, 1, 1], [], []>} : vector<32x32xf32>, vector<32x2xf32>, vector<32x2xf32> -> vector<32x2xf32>
    %28 = arith.addf %26, %27 : vector<32x2xf32>
    %29 = math.tanh %28 : vector<32x2xf32>
    %c3 = arith.constant 3 : index
    %c0_12 = arith.constant 0 : index
    %30 = vector.load %arg1[%c3, %c0_12] : memref<8x2xf32, #tpu.memory_space<vmem>>, vector<1x2xf32>
    %31 = vector.broadcast %0 : vector<32x1xf32> to vector<32x2xf32>
    %32 = vector.broadcast %30 : vector<1x2xf32> to vector<32x2xf32>
    %33 = arith.mulf %31, %32 : vector<32x2xf32>
    %34 = arith.addf %33, %4 : vector<32x2xf32>
    %cst_13 = arith.constant dense<0.000000e+00> : vector<32x2xf32>
    %35 = tpu.matmul %1, %29, %cst_13 {dimension_numbers = #tpu.dot_dimension_numbers<[1], [0], [0], [1], [0, 0, 1, 1], [], []>} : vector<32x32xf32>, vector<32x2xf32>, vector<32x2xf32> -> vector<32x2xf32>
    %36 = arith.addf %34, %35 : vector<32x2xf32>
    %37 = math.tanh %36 : vector<32x2xf32>
    %c4 = arith.constant 4 : index
    %c0_14 = arith.constant 0 : index
    %38 = vector.load %arg1[%c4, %c0_14] : memref<8x2xf32, #tpu.memory_space<vmem>>, vector<1x2xf32>
    %39 = vector.broadcast %0 : vector<32x1xf32> to vector<32x2xf32>
    %40 = vector.broadcast %38 : vector<1x2xf32> to vector<32x2xf32>
    %41 = arith.mulf %39, %40 : vector<32x2xf32>
    %42 = arith.addf %41, %4 : vector<32x2xf32>
    %cst_15 = arith.constant dense<0.000000e+00> : vector<32x2xf32>
    %43 = tpu.matmul %1, %37, %cst_15 {dimension_numbers = #tpu.dot_dimension_numbers<[1], [0], [0], [1], [0, 0, 1, 1], [], []>} : vector<32x32xf32>, vector<32x2xf32>, vector<32x2xf32> -> vector<32x2xf32>
    %44 = arith.addf %42, %43 : vector<32x2xf32>
    %45 = math.tanh %44 : vector<32x2xf32>
    %c5 = arith.constant 5 : index
    %c0_16 = arith.constant 0 : index
    %46 = vector.load %arg1[%c5, %c0_16] : memref<8x2xf32, #tpu.memory_space<vmem>>, vector<1x2xf32>
    %47 = vector.broadcast %0 : vector<32x1xf32> to vector<32x2xf32>
    %48 = vector.broadcast %46 : vector<1x2xf32> to vector<32x2xf32>
    %49 = arith.mulf %47, %48 : vector<32x2xf32>
    %50 = arith.addf %49, %4 : vector<32x2xf32>
    %cst_17 = arith.constant dense<0.000000e+00> : vector<32x2xf32>
    %51 = tpu.matmul %1, %45, %cst_17 {dimension_numbers = #tpu.dot_dimension_numbers<[1], [0], [0], [1], [0, 0, 1, 1], [], []>} : vector<32x32xf32>, vector<32x2xf32>, vector<32x2xf32> -> vector<32x2xf32>
    %52 = arith.addf %50, %51 : vector<32x2xf32>
    %53 = math.tanh %52 : vector<32x2xf32>
    %c6 = arith.constant 6 : index
    %c0_18 = arith.constant 0 : index
    %54 = vector.load %arg1[%c6, %c0_18] : memref<8x2xf32, #tpu.memory_space<vmem>>, vector<1x2xf32>
    %55 = vector.broadcast %0 : vector<32x1xf32> to vector<32x2xf32>
    %56 = vector.broadcast %54 : vector<1x2xf32> to vector<32x2xf32>
    %57 = arith.mulf %55, %56 : vector<32x2xf32>
    %58 = arith.addf %57, %4 : vector<32x2xf32>
    %cst_19 = arith.constant dense<0.000000e+00> : vector<32x2xf32>
    %59 = tpu.matmul %1, %53, %cst_19 {dimension_numbers = #tpu.dot_dimension_numbers<[1], [0], [0], [1], [0, 0, 1, 1], [], []>} : vector<32x32xf32>, vector<32x2xf32>, vector<32x2xf32> -> vector<32x2xf32>
    %60 = arith.addf %58, %59 : vector<32x2xf32>
    %61 = math.tanh %60 : vector<32x2xf32>
    %c7 = arith.constant 7 : index
    %c0_20 = arith.constant 0 : index
    %62 = vector.load %arg1[%c7, %c0_20] : memref<8x2xf32, #tpu.memory_space<vmem>>, vector<1x2xf32>
    %63 = vector.broadcast %0 : vector<32x1xf32> to vector<32x2xf32>
    %64 = vector.broadcast %62 : vector<1x2xf32> to vector<32x2xf32>
    %65 = arith.mulf %63, %64 : vector<32x2xf32>
    %66 = arith.addf %65, %4 : vector<32x2xf32>
    %cst_21 = arith.constant dense<0.000000e+00> : vector<32x2xf32>
    %67 = tpu.matmul %1, %61, %cst_21 {dimension_numbers = #tpu.dot_dimension_numbers<[1], [0], [0], [1], [0, 0, 1, 1], [], []>} : vector<32x32xf32>, vector<32x2xf32>, vector<32x2xf32> -> vector<32x2xf32>
    %68 = arith.addf %66, %67 : vector<32x2xf32>
    %69 = math.tanh %68 : vector<32x2xf32>
    %c0_22 = arith.constant 0 : index
    %c0_23 = arith.constant 0 : index
    %70 = vector.load %arg5[%c0_22, %c0_23] : memref<32x32xf32, #tpu.memory_space<vmem>>, vector<32x32xf32>
    %c0_24 = arith.constant 0 : index
    %c0_25 = arith.constant 0 : index
    %71 = vector.load %arg6[%c0_24, %c0_25] : memref<32x1xf32, #tpu.memory_space<vmem>>, vector<32x1xf32>
    %c0_26 = arith.constant 0 : index
    %c0_27 = arith.constant 0 : index
    %72 = vector.load %arg7[%c0_26, %c0_27] : memref<32x32xf32, #tpu.memory_space<vmem>>, vector<32x32xf32>
    %c0_28 = arith.constant 0 : index
    %c0_29 = arith.constant 0 : index
    %73 = vector.load %arg8[%c0_28, %c0_29] : memref<32x1xf32, #tpu.memory_space<vmem>>, vector<32x1xf32>
    %c0_30 = arith.constant 0 : index
    %c0_31 = arith.constant 0 : index
    %74 = vector.load %arg9[%c0_30, %c0_31] : memref<1x32xf32, #tpu.memory_space<vmem>>, vector<1x32xf32>
    %c0_32 = arith.constant 0 : index
    %c0_33 = arith.constant 0 : index
    %75 = vector.load %arg10[%c0_32, %c0_33] : memref<1x1xf32, #tpu.memory_space<vmem>>, vector<1x1xf32>
    %cst_34 = arith.constant dense<0.000000e+00> : vector<32x2xf32>
    %76 = tpu.matmul %70, %69, %cst_34 {dimension_numbers = #tpu.dot_dimension_numbers<[1], [0], [0], [1], [0, 0, 1, 1], [], []>} : vector<32x32xf32>, vector<32x2xf32>, vector<32x2xf32> -> vector<32x2xf32>
    %77 = vector.broadcast %71 : vector<32x1xf32> to vector<32x2xf32>
    %78 = arith.addf %76, %77 : vector<32x2xf32>
    %79 = math.tanh %78 : vector<32x2xf32>
    %cst_35 = arith.constant dense<0.000000e+00> : vector<32x2xf32>
    %80 = tpu.matmul %72, %79, %cst_35 {dimension_numbers = #tpu.dot_dimension_numbers<[1], [0], [0], [1], [0, 0, 1, 1], [], []>} : vector<32x32xf32>, vector<32x2xf32>, vector<32x2xf32> -> vector<32x2xf32>
    %81 = vector.broadcast %73 : vector<32x1xf32> to vector<32x2xf32>
    %82 = arith.addf %80, %81 : vector<32x2xf32>
    %83 = math.tanh %82 : vector<32x2xf32>
    %cst_36 = arith.constant dense<0.000000e+00> : vector<1x2xf32>
    %84 = tpu.matmul %74, %83, %cst_36 {dimension_numbers = #tpu.dot_dimension_numbers<[1], [0], [0], [1], [0, 0, 1, 1], [], []>} : vector<1x32xf32>, vector<32x2xf32>, vector<1x2xf32> -> vector<1x2xf32>
    %85 = vector.broadcast %75 : vector<1x1xf32> to vector<1x2xf32>
    %86 = arith.addf %84, %85 : vector<1x2xf32>
    %c0_37 = arith.constant 0 : index
    %c0_38 = arith.constant 0 : index
    %87 = vector.load %arg11[%c0_37, %c0_38] : memref<1x2xf32, #tpu.memory_space<vmem>>, vector<1x2xf32>
    tpu.vector_store %arg11[%c0_37, %c0_38], %86 {strides = array<i32>} : memref<1x2xf32, #tpu.memory_space<vmem>>, vector<1x2xf32>,
    return
  }
  func.func @transform_0(%arg0: i32) -> (i32, i32) {
    %c0_i32 = arith.constant 0 : i32
    %c0_i32_0 = arith.constant 0 : i32
    return %c0_i32, %arg0 : i32, i32
  }
  func.func @transform_1(%arg0: i32) -> (i32, i32) {
    %c0_i32 = arith.constant 0 : i32
    %c0_i32_0 = arith.constant 0 : i32
    %c0_i32_1 = arith.constant 0 : i32
    return %c0_i32, %c0_i32_0 : i32, i32
  }
  func.func @transform_2(%arg0: i32) -> (i32, i32) {
    %c0_i32 = arith.constant 0 : i32
    %c0_i32_0 = arith.constant 0 : i32
    %c0_i32_1 = arith.constant 0 : i32
    return %c0_i32, %c0_i32_0 : i32, i32
  }
  func.func @transform_3(%arg0: i32) -> (i32, i32) {
    %c0_i32 = arith.constant 0 : i32
    %c0_i32_0 = arith.constant 0 : i32
    %c0_i32_1 = arith.constant 0 : i32
    return %c0_i32, %c0_i32_0 : i32, i32
  }
  func.func @transform_4(%arg0: i32) -> (i32, i32) {
    %c0_i32 = arith.constant 0 : i32
    %c0_i32_0 = arith.constant 0 : i32
    %c0_i32_1 = arith.constant 0 : i32
    return %c0_i32, %c0_i32_0 : i32, i32
  }
  func.func @transform_5(%arg0: i32) -> (i32, i32) {
    %c0_i32 = arith.constant 0 : i32
    %c0_i32_0 = arith.constant 0 : i32
    %c0_i32_1 = arith.constant 0 : i32
    return %c0_i32, %c0_i32_0 : i32, i32
  }
  func.func @transform_6(%arg0: i32) -> (i32, i32) {
    %c0_i32 = arith.constant 0 : i32
    %c0_i32_0 = arith.constant 0 : i32
    %c0_i32_1 = arith.constant 0 : i32
    return %c0_i32, %c0_i32_0 : i32, i32
  }
  func.func @transform_7(%arg0: i32) -> (i32, i32) {
    %c0_i32 = arith.constant 0 : i32
    %c0_i32_0 = arith.constant 0 : i32
    %c0_i32_1 = arith.constant 0 : i32
    return %c0_i32, %c0_i32_0 : i32, i32
  }
  func.func @transform_8(%arg0: i32) -> (i32, i32) {
    %c0_i32 = arith.constant 0 : i32
    %c0_i32_0 = arith.constant 0 : i32
    %c0_i32_1 = arith.constant 0 : i32
    return %c0_i32, %c0_i32_0 : i32, i32
  }
  func.func @transform_9(%arg0: i32) -> (i32, i32) {
    %c0_i32 = arith.constant 0 : i32
    %c0_i32_0 = arith.constant 0 : i32
    %c0_i32_1 = arith.constant 0 : i32
    return %c0_i32, %c0_i32_0 : i32, i32
  }
  func.func @transform_10(%arg0: i32) -> (i32, i32) {
    %c0_i32 = arith.constant 0 : i32
    %c0_i32_0 = arith.constant 0 : i32
    return %c0_i32, %arg0 : i32, i32
  }
}

</mosaic_0001>

<bundles_post_ra>
// kernel: tpu_custom_call.1
= control target key start
LH: loop header
LB: loop body
LE: loop exit
PB: predicated region body
PF: predicated region fallthrough
CT: control target
= control target key end

     0   :  { %s2142_s0 = inlined_call_operand.vmem [shape: f32[8,2], index: 0, kind: input, shape index: {}]   ;;  %s2143_s1 = inlined_call_operand.vmem [shape: f32[32,1], index: 1, kind: input, shape index: {}]   ;;  %s2144_s2 = inlined_call_operand.vmem [shape: f32[32,32], index: 2, kind: input, shape index: {}]   ;;  %s2145_s3 = inlined_call_operand.vmem [shape: f32[32,1], index: 3, kind: input, shape index: {}]   ;;  %s2146_s4 = inlined_call_operand.vmem [shape: f32[32,32], index: 4, kind: input, shape index: {}]   ;;  %s2147_s5 = inlined_call_operand.vmem [shape: f32[32,1], index: 5, kind: input, shape index: {}]   ;;  %s2148_s6 = inlined_call_operand.vmem [shape: f32[32,32], index: 6, kind: input, shape index: {}]   ;;  %s2149_s7 = inlined_call_operand.vmem [shape: f32[32,1], index: 7, kind: input, shape index: {}]   ;;  %s2150_s8 = inlined_call_operand.vmem [shape: f32[1,32], index: 8, kind: input, shape index: {}]   ;;  %s2151_s9 = inlined_call_operand.<no memory space> [shape: f32[1,1], index: 9, kind: input, shape index: {}]   ;;  %s2152_s10 = inlined_call_operand.hbm [shape: f32[1,2], index: 10, kind: output, shape index: {}]  }
   0x1   :  { %v15_v0 = vstv %s2151_s9 }
   0x2   :  { %16 = vst [vmem:[#allocation2] sm:$0x1] %v15_v0 }
   0x3   :  { %v1840_v1 = vld [vmem:[%s2144_s2] sm:$0xff]  ;;  %vm103_vm0 = vcmask 261120   ;;  %v1845_v2 = vld [vmem:[%s2144_s2 + $0x8] sm:$0xff]  ;;  %v1774_v3 = vmov 0.0   ;;  %v1853_v4 = vld [vmem:[%s2144_s2 + $0x10] sm:$0xff]  ;;  %v1775_v6 = vmov 0  }
   0x4   :  { %1440 = vmatprep.subr.mxu0 %v1774_v3  ;;  %1442 = vmatprep.mubr.msk.f32.mxu0 %vm103_vm0, %v1840_v1  ;;  %v38_v5 = vld [vmem:[%s2143_s1] sm:$0xff]  ;;  %v1869_v8 = vld [vmem:[%s2144_s2 + $0x18] sm:$0xff]  ;;  %v39_v9 = vld [vmem:[%s2143_s1 + $0x8] sm:$0xff] }
   0x5   :  { %1441 = vmatpush3.msra.mxu0 %v1774_v3  ;;  %1668 = vset.pattern.permute.xlu0 %v1775_v6  ;;  %v46_v7 = vld [vmem:[%s2145_s3] sm:$0xff]  ;;  %v47_v10 = vld [vmem:[%s2145_s3 + $0x8] sm:$0xff] }
   0x6   :  { %1443 = vmatmul.mubr.msk.f32.vlgmr.msra.gmra.mrb[0].mxu0 %vm103_vm0, %v1845_v2  ;;  %73 = vperm.xlu0 %1668, %v38_v5  }
   0x7   :  { %1445 = vmatprep.mubr.msk.f32.mxu0 %vm103_vm0, %v1853_v4  ;;  %1669 = vset.pattern.permute.xlu1 %v1775_v6 }
   0x8   :  { %52 = vperm.xlu1 %1669, %v46_v7   ;;  %1456 = vmatprep.mubr.msk.f32.mxu1 %vm103_vm0, %v1840_v1 }
   0xa   :  { %1446 = vmatmul.mubr.msk.f32.gmra.mrb[2].mxu0 %vm103_vm0, %v1869_v8  ;;  %78 = vperm.xlu0 %1668, %v39_v9  }
   0xb   :  { %17 = vsyncpa [#allocation4], 0  ;;  %v40_v11 = vld [vmem:[%s2143_s1 + $0x10] sm:$0xff]  ;;  %1470 = vmatprep.mubr.msk.f32.mxu0 %vm103_vm0, %v1840_v1  ;;  %v41_v12 = vld [vmem:[%s2143_s1 + $0x18] sm:$0xff]  ;;  %vm1777_vm1 = vmmov 0   ;;  %s1778_s13 = smov [#allocation3]  }
   0xc   :  { %57 = vperm.xlu1 %1669, %v47_v10   ;;  %v48_v13 = vld [vmem:[%s2145_s3 + $0x10] sm:$0xff]  ;;  %v49_v14 = vld [vmem:[%s2145_s3 + $0x18] sm:$0xff]  ;;  %v955_v15 = vld [vmem:[%s2147_s5] sm:$0xff]  ;;  %s1301_s14 = sshll.u32 %s1778_s13, 4  ;;  %vm1293_vm2 = vcmask 8192   ;;  %s1302_s14 = int_to_ptr.vmem [resolvable:$true] %s1301_s14 }
   0xd   :  { %v956_v16 = vld [vmem:[%s2147_s5 + $0x8] sm:$0xff]  ;;  %v957_v17 = vld [vmem:[%s2147_s5 + $0x10] sm:$0xff]  ;;  %v958_v18 = vld [vmem:[%s2147_s5 + $0x18] sm:$0xff]  ;;  %s1750_s15 = scalar_lea.vmem %s1302_s14, 16  ;;  %p1755_p1 = scmp.lt.s32.totalorder %s1302_s14, %s1302_s14 }
   0xe   :  { %83 = vperm.xlu0 %1668, %v40_v11   ;;  %v963_v19 = vld [vmem:[%s2149_s7] sm:$0xff]  ;;  %v964_v20 = vld [vmem:[%s2149_s7 + $0x8] sm:$0xff]  ;;  %v965_v21 = vld [vmem:[%s2149_s7 + $0x10] sm:$0xff]  ;;  %p1751_p0 = scmp.ne.s32.totalorder %s1302_s14, %s1750_s15 }
   0xf   :  { %v966_v22 = vld [vmem:[%s2149_s7 + $0x18] sm:$0xff]  ;;  %v968_v23 = vld [vmem:[#allocation2] sm:$0x1]  ;;  %v1314_v24 = vld [vmem:[%s2142_s0 + $0x1] ss:$0 sm:$0xff]  ;;  %s1754_s7 = scalar_lea.vmem %s1302_s14, 32 }
  0x10   :  { %88 = vperm.xlu1 %1669, %v41_v12   ;;  %v1319_v25 = vld [vmem:[%s2142_s0 + $0x2] ss:$0 sm:$0xff]  ;;  %v1324_v26 = vld [vmem:[%s2142_s0 + $0x3] ss:$0 sm:$0xff]  ;;  %v1329_v27 = vld [vmem:[%s2142_s0 + $0x4] ss:$0 sm:$0xff]  ;;  %p1756_p2 = scmp.lt.s32.totalorder %s1754_s7, %s1750_s15 }
  0x11   :  { %v1334_v28 = vld [vmem:[%s2142_s0 + $0x5] ss:$0 sm:$0xff]  ;;  %v1339_v29 = vld [vmem:[%s2142_s0 + $0x6] ss:$0 sm:$0xff]  ;;  %v1344_v30 = vld [vmem:[%s2142_s0 + $0x7] ss:$0 sm:$0xff] }
  0x12   :  { %62 = vperm.xlu0 %1668, %v48_v13   ;;  %p1757_p3 = por %p1756_p2, %p1755_p1 }
  0x14   :  { %67 = vperm.xlu1 %1669, %v49_v14   ;;  %p1758_p4 = pnand %p1757_p3, %p1751_p0 }
  0x16   :  { %971 = vperm.xlu0 %1668, %v955_v15  }
  0x18   :  { %976 = vperm.xlu1 %1669, %v956_v16  }
  0x1a   :  { %981 = vperm.xlu0 %1668, %v957_v17  }
  0x1c   :  { %986 = vperm.xlu1 %1669, %v958_v18  }
  0x1e   :  { %1092 = vperm.xlu0 %1668, %v963_v19  }
  0x20   :  { %1097 = vperm.xlu1 %1669, %v964_v20  }
  0x22   :  { %1102 = vperm.xlu0 %1668, %v965_v21  }
  0x24   :  { %1107 = vperm.xlu1 %1669, %v966_v22  }
  0x26   :  { %1213 = vperm.xlu0 %1668, %v968_v23  }
  0x85   :  { %v1940_v31 = vpop.permute.xlu0 %73 }
  0x86   :  { %v214_v32 = vmul.f32 %v1314_v24, %v1940_v31  ;;  %v320_v33 = vmul.f32 %v1319_v25, %v1940_v31  ;;  %v426_v34 = vmul.f32 %v1324_v26, %v1940_v31  ;;  %v532_v36 = vmul.f32 %v1329_v27, %v1940_v31 }
  0x87   :  { %v1945_v35 = vpop.permute.xlu1 %52  ;;  %v638_v37 = vmul.f32 %v1334_v28, %v1940_v31  ;;  %v744_v38 = vmul.f32 %v1339_v29, %v1940_v31  ;;  %v850_v39 = vmul.f32 %v1344_v30, %v1940_v31 }
  0x88   :  { %v1952_v40 = vadd.f32 %v214_v32, %v1945_v35  ;;  %v1955_v41 = vadd.f32 %v320_v33, %v1945_v35  ;;  %v1958_v42 = vadd.f32 %v426_v34, %v1945_v35  ;;  %v1961_v44 = vadd.f32 %v532_v36, %v1945_v35 }
  0x89   :  { %v79_v43 = vpop.permute.xlu0 %78  ;;  %v1964_v45 = vadd.f32 %v638_v37, %v1945_v35  ;;  %v1967_v46 = vadd.f32 %v744_v38, %v1945_v35  ;;  %v1970_v47 = vadd.f32 %v850_v39, %v1945_v35  ;;  %v1309_v38 = vld [vmem:[%s2142_s0] ss:$0 sm:$0xff] }
  0x8a   :  { %v215_v48 = vmul.f32 %v1314_v24, %v79_v43  ;;  %v321_v49 = vmul.f32 %v1319_v25, %v79_v43  ;;  %v427_v50 = vmul.f32 %v1324_v26, %v79_v43  ;;  %v533_v52 = vmul.f32 %v1329_v27, %v79_v43 }
  0x8b   :  { %v58_v51 = vpop.permute.xlu1 %57  ;;  %v639_v53 = vmul.f32 %v1334_v28, %v79_v43  ;;  %v745_v54 = vmul.f32 %v1339_v29, %v79_v43  ;;  %v851_v55 = vmul.f32 %v1344_v30, %v79_v43  ;;  %v96_v39 = vmul.f32 %v1309_v38, %v79_v43 }
  0x8c   :  { %v1972_v56 = vadd.f32 %v215_v48, %v58_v51  ;;  %v1974_v57 = vadd.f32 %v321_v49, %v58_v51  ;;  %v1976_v58 = vadd.f32 %v427_v50, %v58_v51  ;;  %v1978_v60 = vadd.f32 %v533_v52, %v58_v51 }
  0x8d   :  { %v84_v59 = vpop.permute.xlu0 %83  ;;  %v1980_v61 = vadd.f32 %v639_v53, %v58_v51  ;;  %v1982_v62 = vadd.f32 %v745_v54, %v58_v51  ;;  %v1984_v63 = vadd.f32 %v851_v55, %v58_v51  ;;  %v95_v48 = vmul.f32 %v1309_v38, %v1940_v31 }
  0x8e   :  { %v216_v0 = vmul.f32 %v1314_v24, %v84_v59  ;;  %v322_v5 = vmul.f32 %v1319_v25, %v84_v59  ;;  %v428_v6 = vmul.f32 %v1324_v26, %v84_v59  ;;  %v534_v9 = vmul.f32 %v1329_v27, %v84_v59 }
  0x8f   :  { %v89_v7 = vpop.permute.xlu1 %88  ;;  %v640_v10 = vmul.f32 %v1334_v28, %v84_v59  ;;  %v746_v11 = vmul.f32 %v1339_v29, %v84_v59  ;;  %v852_v12 = vmul.f32 %v1344_v30, %v84_v59  ;;  %v100_v49 = vadd.f32 %v96_v39, %v58_v51 }
  0x90   :  { %v217_v13 = vmul.f32 %v1314_v24, %v89_v7  ;;  %v323_v14 = vmul.f32 %v1319_v25, %v89_v7  ;;  %v429_v15 = vmul.f32 %v1324_v26, %v89_v7  ;;  %v535_v17 = vmul.f32 %v1329_v27, %v89_v7 }
  0x91   :  { %v63_v16 = vpop.permute.xlu0 %62  ;;  %v641_v18 = vmul.f32 %v1334_v28, %v89_v7  ;;  %v747_v19 = vmul.f32 %v1339_v29, %v89_v7  ;;  %v853_v20 = vmul.f32 %v1344_v30, %v89_v7  ;;  %v98_v50 = vmul.f32 %v1309_v38, %v89_v7 }
  0x92   :  { %v220_v21 = vadd.f32 %v216_v0, %v63_v16  ;;  %v1986_v22 = vadd.f32 %v322_v5, %v63_v16  ;;  %v1988_v23 = vadd.f32 %v428_v6, %v63_v16  ;;  %v1990_v33 = vadd.f32 %v534_v9, %v63_v16 }
  0x93   :  { %v68_v32 = vpop.permute.xlu1 %67  ;;  %v1992_v34 = vadd.f32 %v640_v10, %v63_v16  ;;  %v1994_v36 = vadd.f32 %v746_v11, %v63_v16  ;;  %v1996_v24 = vadd.f32 %v852_v12, %v63_v16  ;;  %v99_v53 = vadd.f32 %v95_v48, %v1945_v35 }
  0x94   :  { %v221_v25 = vadd.f32 %v217_v13, %v68_v32  ;;  %v1998_v26 = vadd.f32 %v323_v14, %v68_v32  ;;  %v2000_v27 = vadd.f32 %v429_v15, %v68_v32  ;;  %v2002_v28 = vadd.f32 %v535_v17, %v68_v32 }
  0x95   :  { %v2004_v29 = vadd.f32 %v641_v18, %v68_v32  ;;  %v2006_v30 = vadd.f32 %v747_v19, %v68_v32  ;;  %v2008_v37 = vadd.f32 %v853_v20, %v68_v32  ;;  %v97_v54 = vmul.f32 %v1309_v38, %v84_v59 }
  0x96   :  { %v102_v6 = vadd.f32 %v98_v50, %v68_v32 }
  0x97   :  { %v101_v10 = vadd.f32 %v97_v54, %v63_v16 }
  0xd9   :  { %v1444_v52 = vpop.f32.mrb[0].mxu0 }
  0xda   :  { %v202_v55 = vadd.f32 %v1444_v52, %v100_v49  ;;  %v182_v0 = vpop.f32.mrb[1].mxu0 }
  0xdb   :  { %v201_v5 = vadd.f32 %v182_v0, %v99_v53 }
  0xdc   :  { %1670 = vtanh.f32 %v202_v55 }
  0xdd   :  { %1672 = vtanh.f32 %v201_v5  ;;  %v1447_v9 = vpop.f32.mrb[2].mxu0 }
  0xde   :  { %v204_v11 = vadd.f32 %v1447_v9, %v102_v6  ;;  %v192_v12 = vpop.f32.mrb[3].mxu0 }
  0xdf   :  { %v203_v13 = vadd.f32 %v192_v12, %v101_v10 }
  0xe0   :  { %1674 = vtanh.f32 %v204_v11 }
  0xe1   :  { %1676 = vtanh.f32 %v203_v13 }
  0xe6   :  { %v1671_v31 = vpop.eup %1670 }
  0xe7   :  { %v1673_v43 = vpop.eup %1672 }
  0xe8   :  { %v1585_v51 = vpack.c.bf16 %v1671_v31, %v1673_v43 }
  0xea   :  { %v1675_v7 = vpop.eup %1674  ;;  %1586 = vmatprep.subr.bf16.mxu1 %v1585_v51 }
  0xeb   :  { %v1677_v35 = vpop.eup %1676  ;;  %1588 = vmatpush3.bf16.msra.mxu1 %v1585_v51 }
  0xec   :  { %v1589_v59 = vpack.c.bf16 %v1675_v7, %v1677_v35 }
  0xee   :  { %1590 = vmatprep.subr.bf16.mxu1 %v1589_v59 }
  0xef   :  { %1592 = vmatpush3.bf16.msra.mxu1 %v1589_v59 }
  0xf2   :  { %1457 = vmatmul.mubr.msk.f32.vlgmr.msra.gmra.mrb[0].mxu1 %vm103_vm0, %v1845_v2 }
  0xf3   :  { %1459 = vmatprep.mubr.msk.f32.mxu1 %vm103_vm0, %v1853_v4 }
  0xf6   :  { %1460 = vmatmul.mubr.msk.f32.gmra.mrb[2].mxu1 %vm103_vm0, %v1869_v8 }
  0xf7   :  { %1484 = vmatprep.mubr.msk.f32.mxu1 %vm103_vm0, %v1840_v1 }
 0x1c5   :  { %v1458_v14 = vpop.f32.mrb[0].mxu1 }
 0x1c6   :  { %v308_v15 = vadd.f32 %v1458_v14, %v1972_v56  ;;  %v288_v16 = vpop.f32.mrb[1].mxu1 }
 0x1c7   :  { %v307_v17 = vadd.f32 %v288_v16, %v1952_v40 }
 0x1c8   :  { %1678 = vtanh.f32 %v308_v15 }
 0x1c9   :  { %1680 = vtanh.f32 %v307_v17  ;;  %v1461_v18 = vpop.f32.mrb[2].mxu1 }
 0x1ca   :  { %v310_v19 = vadd.f32 %v1461_v18, %v221_v25  ;;  %v298_v20 = vpop.f32.mrb[3].mxu1 }
 0x1cb   :  { %v309_v32 = vadd.f32 %v298_v20, %v220_v21 }
 0x1cc   :  { %1682 = vtanh.f32 %v310_v19 }
 0x1cd   :  { %1684 = vtanh.f32 %v309_v32 }
 0x1d2   :  { %v1679_v38 = vpop.eup %1678 }
 0x1d3   :  { %v1681_v39 = vpop.eup %1680 }
 0x1d4   :  { %v1593_v48 = vpack.c.bf16 %v1679_v38, %v1681_v39 }
 0x1d6   :  { %v1683_v49 = vpop.eup %1682  ;;  %1594 = vmatprep.subr.bf16.mxu0 %v1593_v48 }
 0x1d7   :  { %v1685_v50 = vpop.eup %1684  ;;  %1596 = vmatpush3.bf16.msra.mxu0 %v1593_v48 }
 0x1d8   :  { %v1597_v52 = vpack.c.bf16 %v1683_v49, %v1685_v50 }
 0x1da   :  { %1598 = vmatprep.subr.bf16.mxu0 %v1597_v52 }
 0x1db   :  { %1600 = vmatpush3.bf16.msra.mxu0 %v1597_v52 }
 0x1de   :  { %1471 = vmatmul.mubr.msk.f32.vlgmr.msra.gmra.mrb[4].mxu0 %vm103_vm0, %v1845_v2 }
 0x1df   :  { %1473 = vmatprep.mubr.msk.f32.mxu0 %vm103_vm0, %v1853_v4 }
 0x1e2   :  { %1474 = vmatmul.mubr.msk.f32.gmra.mrb[6].mxu0 %vm103_vm0, %v1869_v8 }
 0x1e3   :  { %1498 = vmatprep.mubr.msk.f32.mxu0 %vm103_vm0, %v1840_v1 }
 0x2b1   :  { %v1472_v40 = vpop.f32.mrb[4].mxu0 }
 0x2b2   :  { %v414_v56 = vadd.f32 %v1472_v40, %v1974_v57  ;;  %v394_v21 = vpop.f32.mrb[5].mxu0 }
 0x2b3   :  { %v413_v25 = vadd.f32 %v394_v21, %v1955_v41 }
 0x2b4   :  { %1686 = vtanh.f32 %v414_v56 }
 0x2b5   :  { %1688 = vtanh.f32 %v413_v25  ;;  %v1475_v53 = vpop.f32.mrb[6].mxu0 }
 0x2b6   :  { %v416_v54 = vadd.f32 %v1475_v53, %v1998_v26  ;;  %v404_v55 = vpop.f32.mrb[7].mxu0 }
 0x2b7   :  { %v415_v0 = vadd.f32 %v404_v55, %v1986_v22 }
 0x2b8   :  { %1690 = vtanh.f32 %v416_v54 }
 0x2b9   :  { %1692 = vtanh.f32 %v415_v0 }
 0x2be   :  { %v1687_v5 = vpop.eup %1686 }
 0x2bf   :  { %v1689_v6 = vpop.eup %1688 }
 0x2c0   :  { %v1601_v9 = vpack.c.bf16 %v1687_v5, %v1689_v6 }
 0x2c2   :  { %v1691_v10 = vpop.eup %1690  ;;  %1602 = vmatprep.subr.bf16.mxu1 %v1601_v9 }
 0x2c3   :  { %v1693_v11 = vpop.eup %1692  ;;  %1604 = vmatpush3.bf16.msra.mxu1 %v1601_v9 }
 0x2c4   :  { %v1605_v57 = vpack.c.bf16 %v1691_v10, %v1693_v11 }
 0x2c6   :  { %1606 = vmatprep.subr.bf16.mxu1 %v1605_v57 }
 0x2c7   :  { %1608 = vmatpush3.bf16.msra.mxu1 %v1605_v57 }
 0x2ca   :  { %1485 = vmatmul.mubr.msk.f32.vlgmr.msra.gmra.mrb[4].mxu1 %vm103_vm0, %v1845_v2 }
 0x2cb   :  { %1487 = vmatprep.mubr.msk.f32.mxu1 %vm103_vm0, %v1853_v4 }
 0x2ce   :  { %1488 = vmatmul.mubr.msk.f32.gmra.mrb[6].mxu1 %vm103_vm0, %v1869_v8 }
 0x2cf   :  { %1512 = vmatprep.mubr.msk.f32.mxu1 %vm103_vm0, %v1840_v1 }
 0x39d   :  { %v1486_v41 = vpop.f32.mrb[4].mxu1 }
 0x39e   :  { %v520_v22 = vadd.f32 %v1486_v41, %v1976_v58  ;;  %v500_v26 = vpop.f32.mrb[5].mxu1 }
 0x39f   :  { %v519_v12 = vadd.f32 %v500_v26, %v1958_v42 }
 0x3a0   :  { %1694 = vtanh.f32 %v520_v22 }
 0x3a1   :  { %1696 = vtanh.f32 %v519_v12  ;;  %v1489_v13 = vpop.f32.mrb[6].mxu1 }
 0x3a2   :  { %v522_v31 = vadd.f32 %v1489_v13, %v2000_v27  ;;  %v510_v43 = vpop.f32.mrb[7].mxu1 }
 0x3a3   :  { %v521_v51 = vadd.f32 %v510_v43, %v1988_v23 }
 0x3a4   :  { %1698 = vtanh.f32 %v522_v31 }
 0x3a5   :  { %1700 = vtanh.f32 %v521_v51 }
 0x3aa   :  { %v1695_v7 = vpop.eup %1694 }
 0x3ab   :  { %v1697_v35 = vpop.eup %1696 }
 0x3ac   :  { %v1609_v59 = vpack.c.bf16 %v1695_v7, %v1697_v35 }
 0x3ae   :  { %v1699_v14 = vpop.eup %1698  ;;  %1610 = vmatprep.subr.bf16.mxu0 %v1609_v59 }
 0x3af   :  { %v1701_v15 = vpop.eup %1700  ;;  %1612 = vmatpush3.bf16.msra.mxu0 %v1609_v59 }
 0x3b0   :  { %v1613_v58 = vpack.c.bf16 %v1699_v14, %v1701_v15  ;;  %v959_v14 = vld [vmem:[%s2148_s6] sm:$0xff]  ;;  %v977_v15 = vpop.permute.xlu1 %976 }
 0x3b2   :  { %1614 = vmatprep.subr.bf16.mxu0 %v1613_v58 }
 0x3b3   :  { %1616 = vmatpush3.bf16.msra.mxu0 %v1613_v58  ;;  %v972_v58 = vpop.permute.xlu0 %971 }
 0x3b6   :  { %1499 = vmatmul.mubr.msk.f32.vlgmr.msra.gmra.mrb[8].mxu0 %vm103_vm0, %v1845_v2 }
 0x3b7   :  { %1501 = vmatprep.mubr.msk.f32.mxu0 %vm103_vm0, %v1853_v4 }
 0x3ba   :  { %1502 = vmatmul.mubr.msk.f32.gmra.mrb[10].mxu0 %vm103_vm0, %v1869_v8 }
 0x3bb   :  { %1526 = vmatprep.mubr.msk.f32.mxu0 %vm103_vm0, %v1840_v1 }
 0x489   :  { %v1500_v42 = vpop.f32.mrb[8].mxu0 }
 0x48a   :  { %v626_v23 = vadd.f32 %v1500_v42, %v1978_v60  ;;  %v606_v27 = vpop.f32.mrb[9].mxu0 }
 0x48b   :  { %v625_v16 = vadd.f32 %v606_v27, %v1961_v44 }
 0x48c   :  { %1702 = vtanh.f32 %v626_v23 }
 0x48d   :  { %1704 = vtanh.f32 %v625_v16  ;;  %v1503_v17 = vpop.f32.mrb[10].mxu0 }
 0x48e   :  { %v628_v18 = vadd.f32 %v1503_v17, %v2002_v28  ;;  %v616_v19 = vpop.f32.mrb[11].mxu0  ;;  %v987_v17 = vpop.permute.xlu1 %986 }
 0x48f   :  { %v627_v20 = vadd.f32 %v616_v19, %v1990_v33  ;;  %v982_v19 = vpop.permute.xlu0 %981 }
 0x490   :  { %1706 = vtanh.f32 %v628_v18 }
 0x491   :  { %1708 = vtanh.f32 %v627_v20 }
 0x496   :  { %v1703_v32 = vpop.eup %1702 }
 0x497   :  { %v1705_v38 = vpop.eup %1704 }
 0x498   :  { %v1617_v39 = vpack.c.bf16 %v1703_v32, %v1705_v38 }
 0x49a   :  { %v1707_v48 = vpop.eup %1706  ;;  %1618 = vmatprep.subr.bf16.mxu1 %v1617_v39 }
 0x49b   :  { %v1709_v49 = vpop.eup %1708  ;;  %1620 = vmatpush3.bf16.msra.mxu1 %v1617_v39 }
 0x49c   :  { %v1621_v60 = vpack.c.bf16 %v1707_v48, %v1709_v49 }
 0x49e   :  { %1622 = vmatprep.subr.bf16.mxu1 %v1621_v60 }
 0x49f   :  { %1624 = vmatpush3.bf16.msra.mxu1 %v1621_v60 }
 0x4a2   :  { %1513 = vmatmul.mubr.msk.f32.vlgmr.msra.gmra.mrb[8].mxu1 %vm103_vm0, %v1845_v2 }
 0x4a3   :  { %1515 = vmatprep.mubr.msk.f32.mxu1 %vm103_vm0, %v1853_v4 }
 0x4a6   :  { %1516 = vmatmul.mubr.msk.f32.gmra.mrb[10].mxu1 %vm103_vm0, %v1869_v8 }
 0x4a7   :  { %1540 = vmatprep.mubr.msk.f32.mxu1 %vm103_vm0, %v1840_v1 }
 0x575   :  { %v1514_v44 = vpop.f32.mrb[8].mxu1 }
 0x576   :  { %v732_v33 = vadd.f32 %v1514_v44, %v1980_v61  ;;  %v712_v28 = vpop.f32.mrb[9].mxu1 }
 0x577   :  { %v731_v50 = vadd.f32 %v712_v28, %v1964_v45  ;;  %v960_v28 = vld [vmem:[%s2148_s6 + $0x8] sm:$0xff] }
 0x578   :  { %1710 = vtanh.f32 %v732_v33 }
 0x579   :  { %1712 = vtanh.f32 %v731_v50  ;;  %v1517_v52 = vpop.f32.mrb[10].mxu1  ;;  %v961_v50 = vld [vmem:[%s2148_s6 + $0x10] sm:$0xff] }
 0x57a   :  { %v734_v40 = vadd.f32 %v1517_v52, %v2004_v29  ;;  %v722_v56 = vpop.f32.mrb[11].mxu1  ;;  %v962_v52 = vld [vmem:[%s2148_s6 + $0x18] sm:$0xff] }
 0x57b   :  { %v733_v21 = vadd.f32 %v722_v56, %v1992_v34  ;;  %v1098_v56 = vpop.permute.xlu1 %1097 }
 0x57c   :  { %1714 = vtanh.f32 %v734_v40  ;;  %v1776_v40 = vmov 0.0|0.0  }
 0x57d   :  { %1716 = vtanh.f32 %v733_v21  ;;  %v1093_v21 = vpop.permute.xlu0 %1092 }
 0x582   :  { %v1711_v25 = vpop.eup %1710 }
 0x583   :  { %v1713_v53 = vpop.eup %1712 }
 0x584   :  { %v1625_v54 = vpack.c.bf16 %v1711_v25, %v1713_v53 }
 0x586   :  { %v1715_v1 = vpop.eup %1714  ;;  %1626 = vmatprep.subr.bf16.mxu0 %v1625_v54 }
 0x587   :  { %v1717_v55 = vpop.eup %1716  ;;  %1628 = vmatpush3.bf16.msra.mxu0 %v1625_v54 }
 0x588   :  { %v1629_v61 = vpack.c.bf16 %v1715_v1, %v1717_v55  ;;  %v1108_v55 = vpop.permute.xlu1 %1107 }
 0x58a   :  { %1630 = vmatprep.subr.bf16.mxu0 %v1629_v61 }
 0x58b   :  { %1632 = vmatpush3.bf16.msra.mxu0 %v1629_v61 }
 0x58e   :  { %1527 = vmatmul.mubr.msk.f32.vlgmr.msra.gmra.mrb[12].mxu0 %vm103_vm0, %v1845_v2 }
 0x58f   :  { %1529 = vmatprep.mubr.msk.f32.mxu0 %vm103_vm0, %v1853_v4 }
 0x592   :  { %1530 = vmatmul.mubr.msk.f32.gmra.mrb[14].mxu0 %vm103_vm0, %v1869_v8 }
 0x661   :  { %v1528_v45 = vpop.f32.mrb[12].mxu0 }
 0x662   :  { %v838_v34 = vadd.f32 %v1528_v45, %v1982_v62  ;;  %v818_v29 = vpop.f32.mrb[13].mxu0  ;;  %v1103_v45 = vpop.permute.xlu0 %1102 }
 0x663   :  { %v837_v0 = vadd.f32 %v818_v29, %v1967_v46  ;;  %v951_v46 = vld [vmem:[%s2146_s4] sm:$0xff] }
 0x664   :  { %1718 = vtanh.f32 %v838_v34  ;;  %1554 = vmatprep.mubr.msk.f32.mxu0 %vm103_vm0, %v951_v46 }
 0x665   :  { %1720 = vtanh.f32 %v837_v0  ;;  %v1531_v5 = vpop.f32.mrb[14].mxu0 }
 0x666   :  { %v840_v6 = vadd.f32 %v1531_v5, %v2006_v30  ;;  %v828_v9 = vpop.f32.mrb[15].mxu0 }
 0x667   :  { %v839_v10 = vadd.f32 %v828_v9, %v1994_v36 }
 0x668   :  { %1722 = vtanh.f32 %v840_v6 }
 0x669   :  { %1724 = vtanh.f32 %v839_v10 }
 0x66e   :  { %v1719_v11 = vpop.eup %1718 }
 0x66f   :  { %v1721_v57 = vpop.eup %1720 }
 0x670   :  { %v1633_v41 = vpack.c.bf16 %v1719_v11, %v1721_v57  ;;  %v967_v57 = vld [vmem:[%s2150_s8] sm:$0x1] }
 0x672   :  { %v1723_v22 = vpop.eup %1722  ;;  %1634 = vmatprep.subr.bf16.mxu1 %v1633_v41 }
 0x673   :  { %v1725_v26 = vpop.eup %1724  ;;  %1636 = vmatpush3.bf16.msra.mxu1 %v1633_v41  ;;  %v1216_v41 = vlaneseq }
 0x674   :  { %v1637_v62 = vpack.c.bf16 %v1723_v22, %v1725_v26 }
 0x675   :  { %v1217_v22 = vshrl.u32 %v1216_v41, 7 }
 0x676   :  { %1638 = vmatprep.subr.bf16.mxu1 %v1637_v62 }
 0x677   :  { %1640 = vmatpush3.bf16.msra.mxu1 %v1637_v62  ;;  %v1218_v26 = vsub.s32 0, %v1217_v22  ;;  %v1214_v62 = vpop.permute.xlu0 %1213 }
 0x679   :  { %v1219_v46 = vrot.slane %v1214_v62, %v1218_v26 }
 0x67a   :  { %1541 = vmatmul.mubr.msk.f32.vlgmr.msra.gmra.mrb[12].mxu1 %vm103_vm0, %v1845_v2 }
 0x67b   :  { %1543 = vmatprep.mubr.msk.f32.mxu1 %vm103_vm0, %v1853_v4 }
 0x67e   :  { %1544 = vmatmul.mubr.msk.f32.gmra.mrb[14].mxu1 %vm103_vm0, %v1869_v8 }
 0x67f   :  { %1568 = vmatprep.mubr.msk.f32.mxu1 %vm103_vm0, %v959_v14 }
 0x74d   :  { %v1542_v36 = vpop.f32.mrb[12].mxu1 }
 0x74e   :  { %v944_v30 = vadd.f32 %v1542_v36, %v1984_v63  ;;  %v924_v12 = vpop.f32.mrb[13].mxu1 }
 0x74f   :  { %v943_v13 = vadd.f32 %v924_v12, %v1970_v47  ;;  %v952_v47 = vld [vmem:[%s2146_s4 + $0x8] sm:$0xff] }
 0x750   :  { %1726 = vtanh.f32 %v944_v30 }
 0x751   :  { %1728 = vtanh.f32 %v943_v13  ;;  %v1545_v2 = vpop.f32.mrb[14].mxu1 }
 0x752   :  { %v946_v4 = vadd.f32 %v1545_v2, %v2008_v37  ;;  %v934_v31 = vpop.f32.mrb[15].mxu1  ;;  %v954_v37 = vld [vmem:[%s2146_s4 + $0x18] sm:$0xff] }
 0x753   :  { %v945_v8 = vadd.f32 %v934_v31, %v1996_v24  ;;  %v953_v24 = vld [vmem:[%s2146_s4 + $0x10] sm:$0xff] }
 0x754   :  { %1730 = vtanh.f32 %v946_v4 }
 0x755   :  { %1732 = vtanh.f32 %v945_v8 }
 0x75a   :  { %v1727_v43 = vpop.eup %1726 }
 0x75b   :  { %v1729_v51 = vpop.eup %1728 }
 0x75c   :  { %v1641_v7 = vpack.c.bf16 %v1727_v43, %v1729_v51 }
 0x75e   :  { %v1731_v35 = vpop.eup %1730  ;;  %1642 = vmatprep.subr.bf16.mxu0 %v1641_v7 }
 0x75f   :  { %v1733_v59 = vpop.eup %1732  ;;  %1644 = vmatpush3.bf16.msra.mxu0 %v1641_v7 }
 0x760   :  { %v1645_v63 = vpack.c.bf16 %v1731_v35, %v1733_v59 }
 0x762   :  { %1646 = vmatprep.subr.bf16.mxu0 %v1645_v63 }
 0x763   :  { %1648 = vmatpush3.bf16.msra.mxu0 %v1645_v63 }
 0x764   :  { %1657 = vmatprep.subr.bf16.mxu0 %v1776_v40 }
 0x766   :  { %1555 = vmatmul.mubr.msk.f32.vlgmr.msra.gmra.mrb[16].mxu0 %vm103_vm0, %v952_v47 }
 0x767   :  { %1557 = vmatprep.mubr.msk.f32.mxu0 %vm103_vm0, %v953_v24 }
 0x76a   :  { %1558 = vmatmul.mubr.msk.f32.gmra.mrb[18].mxu0 %vm103_vm0, %v954_v37 }
 0x76b   :  { %1582 = vmatprep.mubr.msk.f32.mxu0 %vm1777_vm1, %v1774_v3 }
 0x839   :  { %v1556_v42 = vpop.f32.mrb[16].mxu0 }
 0x83a   :  { %v1073_v23 = vadd.f32 %v1556_v42, %v977_v15  ;;  %v1067_v27 = vpop.f32.mrb[17].mxu0 }
 0x83b   :  { %v1068_v16 = vadd.f32 %v1067_v27, %v972_v58 }
 0x83c   :  { %1734 = vtanh.f32 %v1073_v23 }
 0x83d   :  { %1736 = vtanh.f32 %v1068_v16  ;;  %v1559_v18 = vpop.f32.mrb[18].mxu0 }
 0x83e   :  { %v1083_v20 = vadd.f32 %v1559_v18, %v987_v17  ;;  %v1077_v32 = vpop.f32.mrb[19].mxu0 }
 0x83f   :  { %v1078_v38 = vadd.f32 %v1077_v32, %v982_v19 }
 0x840   :  { %1738 = vtanh.f32 %v1083_v20 }
 0x841   :  { %1740 = vtanh.f32 %v1078_v38 }
 0x846   :  { %v1735_v39 = vpop.eup %1734 }
 0x847   :  { %v1737_v48 = vpop.eup %1736 }
 0x848   :  { %v1649_v49 = vpack.c.bf16 %v1735_v39, %v1737_v48 }
 0x84a   :  { %v1739_v60 = vpop.eup %1738  ;;  %1650 = vmatprep.subr.bf16.mxu1 %v1649_v49 }
 0x84b   :  { %v1741_v44 = vpop.eup %1740  ;;  %1652 = vmatpush3.bf16.msra.mxu1 %v1649_v49 }
 0x84c   :  { %v1653_v33 = vpack.c.bf16 %v1739_v60, %v1741_v44 }
 0x84e   :  { %1654 = vmatprep.subr.bf16.mxu1 %v1653_v33 }
 0x84f   :  { %1656 = vmatpush3.bf16.msra.mxu1 %v1653_v33 }
 0x852   :  { %1569 = vmatmul.mubr.msk.f32.vlgmr.msra.gmra.mrb[16].mxu1 %vm103_vm0, %v960_v28 }
 0x853   :  { %1571 = vmatprep.mubr.msk.f32.mxu1 %vm103_vm0, %v961_v50 }
 0x856   :  { %1572 = vmatmul.mubr.msk.f32.gmra.mrb[18].mxu1 %vm103_vm0, %v962_v52 }
 0x925   :  { %v1570_v25 = vpop.f32.mrb[16].mxu1 }
 0x926   :  { %v1194_v53 = vadd.f32 %v1570_v25, %v1098_v56  ;;  %v1188_v54 = vpop.f32.mrb[17].mxu1 }
 0x927   :  { %v1189_v1 = vadd.f32 %v1188_v54, %v1093_v21 }
 0x928   :  { %1742 = vtanh.f32 %v1194_v53 }
 0x929   :  { %1744 = vtanh.f32 %v1189_v1  ;;  %v1573_v61 = vpop.f32.mrb[18].mxu1 }
 0x92a   :  { %v1204_v34 = vadd.f32 %v1573_v61, %v1108_v55  ;;  %v1198_v29 = vpop.f32.mrb[19].mxu1 }
 0x92b   :  { %v1199_v0 = vadd.f32 %v1198_v29, %v1103_v45 }
 0x92c   :  { %1746 = vtanh.f32 %v1204_v34 }
 0x92d   :  { %1748 = vtanh.f32 %v1199_v0 }
 0x932   :  { %v1743_v5 = vpop.eup %1742 }
 0x933   :  { %v1745_v6 = vpop.eup %1744 }
 0x934   :  { %v1658_v9 = vpack.c.bf16 %v1743_v5, %v1745_v6 }
 0x936   :  { %v1747_v3 = vpop.eup %1746  ;;  %1659 = vmatpush3.bf16.msra.mxu0 %v1658_v9 }
 0x937   :  { %v1749_v10 = vpop.eup %1748  ;;  %1660 = vmatprep.subr.bf16.mxu0 %v1776_v40 }
 0x938   :  { %v1661_v11 = vpack.c.bf16 %v1747_v3, %v1749_v10 }
 0x93a   :  { %1662 = vmatpush3.bf16.msra.mxu0 %v1661_v11 }
 0x93d   :  { %1583 = vmatmul.mubr.msk.f32.vlgmr.msra.gmra.mrb[20].mxu0 %vm103_vm0, %v967_v57 }
 0xa10   :  { %v1289_v36 = vpop.f32.mrb[20].mxu0 }
 0xa11   :  { %v1290_v30 = vadd.f32 %v1289_v36, %v1219_v46  ;;  %v1584_v12 = vpop.f32.mrb[21].mxu0 }
 0xa13   :  { %1294 = vst.msk [vmem:[#allocation3] sm:$0x1] %vm1293_vm2, %v1290_v30 }
 0xa14   :  { %1761 = shalt.err (!%p1758_p4)
}
 0xa15   :  { %s1762_s17 = scalar_lea.hbm %s2152_s10, 16 }
 0xa16   :  { %p1763_p5 = scmp.ne.s32.totalorder %s2152_s10, %s1762_s17  ;;  %p1766_p6 = scmp.lt.u32.totalorder %s1762_s17, %s2152_s10 }
 0xa18   :  { %p1768_p7 = pnand %p1766_p6, %p1763_p5 }
 0xa1a   :  { %1771 = shalt.err (!%p1768_p7)
}
 0xa1b   :  { %1304 = dma.vmem_to_hbm [thread:$0]  %s1302_s14, 16, %s2152_s10, [#allocation4]  }
 0xa1c   :  { %1772 = dma.done.wait [#allocation4], 16  }
 0xa1d   :  { %1773 = vsyncadd [#allocation4], 4294967280 }
 0xa1e   :  { %1308 = vsyncpa [#allocation4], 1 }

</bundles_post_ra>
